<compile_context>
chip_gen: v7x
topology: tpu7x:2x2x1
jax: 0.10.0
libtpu: 0.0.40
codegen_flags: <defaults>
</compile_context>

<pallas_src>
import math

import jax
import jax.numpy as jnp
from jax.experimental import pallas as pl
from jax.experimental.pallas import tpu as pltpu

# ---- problem sizes (head config) -----------------------------------------------
D = 256      # input_dim
C = 8        # num_classes


# ================================ kernel ========================================

def head_kernel(x_ref, w_ref, b_ref, y_ref):
    """Fused mean/logvar head for one batch tile.

    x_ref: (TB, D)    input features (compute dtype, e.g. bf16)
    w_ref: (D, 2*C)   [W_mu | W_logvar] packed along the output dim
    b_ref: (1, 2*C)   [b_mu | b_logvar] (f32)
    y_ref: (TB, 2*C)  packed [mu | logvar] output (f32)
    """
    y = jnp.dot(x_ref[...], w_ref[...], preferred_element_type=jnp.float32)
    y_ref[...] = y + b_ref[...]          # single hoisted (1, 2C) broadcast


# =============================== wrapper ========================================

def _round_up(n, m):
    return ((n + m - 1) // m) * m


def emotion_uncertainty_head(x, w_pack, b_pack, *, num_classes,
                             tile_b=512, compute_dtype=jnp.bfloat16):
    """Returns (mu, logvar), matching EmotionUncertaintyHeadV1.forward.

    x:      (B, D)  float32
    w_pack: (D, 2C) packed weights, (in, out) layout  (y = x @ W + b)
    b_pack: (1, 2C) packed biases
    """
    batch, d = x.shape
    two_c = w_pack.shape[1]

    # Batch-tile size: multiple of 16 (bf16 sublane tile), capped by tile_b,
    # and no larger than the (padded) batch itself.
    tb = min(tile_b, _round_up(batch, 16))
    tb = _round_up(tb, 16)
    padded = _round_up(batch, tb)

    xc = x.astype(compute_dtype)
    if padded != batch:
        xc = jnp.pad(xc, ((0, padded - batch), (0, 0)))
    wc = w_pack.astype(compute_dtype)
    bc = b_pack.astype(jnp.float32)

    grid = (padded // tb,)

    y = pl.pallas_call(
        head_kernel,
        out_shape=jax.ShapeDtypeStruct((padded, two_c), jnp.float32),
        grid_spec=pltpu.PrefetchScalarGridSpec(
            num_scalar_prefetch=0,
            grid=grid,
            in_specs=[
                pl.BlockSpec((tb, d), lambda i: (i, 0)),        # x tile marches over batch
                pl.BlockSpec((d, two_c), lambda i: (0, 0)),     # W stays resident in VMEM
                pl.BlockSpec((1, two_c), lambda i: (0, 0)),     # bias stays resident
            ],
            out_specs=pl.BlockSpec((tb, two_c), lambda i: (i, 0)),
        ),
        compiler_params=pltpu.CompilerParams(
            dimension_semantics=("parallel",),                  # v7x: shard batch over 2 TCs
        ),
    )(xc, wc, bc)

    y = y[:batch]
    mu = y[:, :num_classes]
    logvar = y[:, num_classes:]
    return mu, logvar


# ============================ parameter init ====================================

def init_params(key):
    k1, k2, k3, k4 = jax.random.split(key, 4)
    # (in, out) layout: y = x @ W + b  (same math as PyTorch's x @ W.T, W (out, in)).
    w_mu = jax.random.normal(k1, (D, C), jnp.float32) / math.sqrt(D)
    w_lv = jax.random.normal(k2, (D, C), jnp.float32) / math.sqrt(D)
    b_mu = 0.01 * jax.random.normal(k3, (1, C), jnp.float32)
    b_lv = 0.01 * jax.random.normal(k4, (1, C), jnp.float32)
    # Pack both heads once at init time -> single MXU matmul inside the kernel.
    w_pack = jnp.concatenate([w_mu, w_lv], axis=1)   # (D, 2C)
    b_pack = jnp.concatenate([b_mu, b_lv], axis=1)   # (1, 2C)
    return w_mu, b_mu, w_lv, b_lv, w_pack, b_pack


# ================================= main =========================================

if __name__ == "__main__":
    key = jax.random.PRNGKey(0)
    pkey, xkey = jax.random.split(key)
    w_mu, b_mu, w_lv, b_lv, w_pack, b_pack = init_params(pkey)

    B = 64                                   # small test batch; grid exercises 2 tiles
    x = jax.random.normal(xkey, (B, D), jnp.float32)

    # pure-JAX f32 reference (same math as the PyTorch module)
    mu_ref = x @ w_mu + b_mu
    lv_ref = x @ w_lv + b_lv

    # --- exactness check on the f32 compute path ---------------------------------
    mu32, lv32 = jax.block_until_ready(
        emotion_uncertainty_head(x, w_pack, b_pack, num_classes=C,
                                 tile_b=32, compute_dtype=jnp.float32))
    assert mu32.shape == (B, C) and lv32.shape == (B, C)
    assert bool(jnp.allclose(mu32, mu_ref, atol=1e-5, rtol=1e-5))
    assert bool(jnp.allclose(lv32, lv_ref, atol=1e-5, rtol=1e-5))

    # --- default (bf16 inputs, f32 accumulate) production path -------------------
    mu, logvar = jax.block_until_ready(
        emotion_uncertainty_head(x, w_pack, b_pack, num_classes=C,
                                 tile_b=32, compute_dtype=jnp.bfloat16))
    assert mu.shape == (B, C) and logvar.shape == (B, C)
    assert bool(jnp.all(jnp.isfinite(mu))) and bool(jnp.all(jnp.isfinite(logvar)))
    assert bool(jnp.allclose(mu, mu_ref, atol=3e-2, rtol=3e-2))
    assert bool(jnp.allclose(logvar, lv_ref, atol=3e-2, rtol=3e-2))

    print("KERNEL_OK")
</pallas_src>

<mosaic_0001>
module attributes {stable_mosaic.version = 11 : i64} {
  func.func @head_kernel(%arg0: i32, %arg1: memref<32x256xf32, #tpu.memory_space<vmem>>, %arg2: memref<256x16xf32, #tpu.memory_space<vmem>>, %arg3: memref<1x16xf32, #tpu.memory_space<vmem>>, %arg4: memref<32x16xf32, #tpu.memory_space<vmem>>) attributes {dimension_semantics = [#tpu.dimension_semantics<parallel>], iteration_bounds = array<i64: 2>, scalar_prefetch = 0 : i64, scratch_operands = 0 : i64, tpu.core_type = #tpu.core_type<tc>, window_params = [{transform_indices = @transform_0, window_bounds = array<i64: 32, 256>}, {pipeline_mode = #tpu.pipeline_mode<synchronous>, transform_indices = @transform_1, window_bounds = array<i64: 256, 16>}, {pipeline_mode = #tpu.pipeline_mode<synchronous>, transform_indices = @transform_2, window_bounds = array<i64: 1, 16>}, {transform_indices = @transform_3, window_bounds = array<i64: 32, 16>}]} {
    %c0 = arith.constant 0 : index
    %c0_0 = arith.constant 0 : index
    %0 = vector.load %arg1[%c0, %c0_0] : memref<32x256xf32, #tpu.memory_space<vmem>>, vector<32x256xf32>
    %c0_1 = arith.constant 0 : index
    %c0_2 = arith.constant 0 : index
    %1 = vector.load %arg2[%c0_1, %c0_2] : memref<256x16xf32, #tpu.memory_space<vmem>>, vector<256x16xf32>
    %cst = arith.constant dense<0.000000e+00> : vector<32x16xf32>
    %2 = tpu.matmul %0, %1, %cst {dimension_numbers = #tpu.dot_dimension_numbers<[1], [0], [0], [1], [0, 0, 1, 1], [], []>} : vector<32x256xf32>, vector<256x16xf32>, vector<32x16xf32> -> vector<32x16xf32>
    %c0_3 = arith.constant 0 : index
    %c0_4 = arith.constant 0 : index
    %3 = vector.load %arg3[%c0_3, %c0_4] : memref<1x16xf32, #tpu.memory_space<vmem>>, vector<1x16xf32>
    %4 = vector.broadcast %3 : vector<1x16xf32> to vector<32x16xf32>
    %5 = arith.addf %2, %4 : vector<32x16xf32>
    %c0_5 = arith.constant 0 : index
    %c0_6 = arith.constant 0 : index
    %6 = vector.load %arg4[%c0_5, %c0_6] : memref<32x16xf32, #tpu.memory_space<vmem>>, vector<32x16xf32>
    tpu.vector_store %arg4[%c0_5, %c0_6], %5 {strides = array<i32>} : memref<32x16xf32, #tpu.memory_space<vmem>>, vector<32x16xf32>,
    return
  }
  func.func @transform_0(%arg0: i32) -> (i32, i32) {
    %c0_i32 = arith.constant 0 : i32
    %c0_i32_0 = arith.constant 0 : i32
    return %arg0, %c0_i32 : i32, i32
  }
  func.func @transform_1(%arg0: i32) -> (i32, i32) {
    %c0_i32 = arith.constant 0 : i32
    %c0_i32_0 = arith.constant 0 : i32
    %c0_i32_1 = arith.constant 0 : i32
    return %c0_i32, %c0_i32_0 : i32, i32
  }
  func.func @transform_2(%arg0: i32) -> (i32, i32) {
    %c0_i32 = arith.constant 0 : i32
    %c0_i32_0 = arith.constant 0 : i32
    %c0_i32_1 = arith.constant 0 : i32
    return %c0_i32, %c0_i32_0 : i32, i32
  }
  func.func @transform_3(%arg0: i32) -> (i32, i32) {
    %c0_i32 = arith.constant 0 : i32
    %c0_i32_0 = arith.constant 0 : i32
    return %arg0, %c0_i32 : i32, i32
  }
}

</mosaic_0001>

<bundles_post_ra>
// kernel: tpu_custom_call.1
= control target key start
LH: loop header
LB: loop body
LE: loop exit
PB: predicated region body
PF: predicated region fallthrough
CT: control target
= control target key end

     0   :  { %s512_s12 = smov 0   ;;  %s642_s0 = inlined_call_operand.vmem [shape: f32[64,256], index: 0, kind: input, shape index: {}]   ;;  %s643_s1 = inlined_call_operand.vmem [shape: f32[256,16], index: 1, kind: input, shape index: {}]   ;;  %s644_s2 = inlined_call_operand.vmem [shape: f32[1,16], index: 2, kind: input, shape index: {}]   ;;  %s645_s3 = inlined_call_operand.vmem [shape: f32[64,16], index: 3, kind: output, shape index: {}]  }
   0x1 LB: > { %s370_s13 = sadd.s32 4294967295, %s490_s12   ;;  %p374_p0 = scmp.ge.s32.totalorder %s490_s12, 1  ;;  %s490_s12 = sphi %s512_s12, %s13_s12  }
   0x2   : > { %p139_p1 = scmp.lt.s32.totalorder %s490_s12, 3 }
   0x4   : > { %p140_p2 = pnand %p374_p0, %p139_p1 }
   0x5   : > { %v201_v0 = vld [vmem:[%s643_s1 + $0x80] sm:$0xff] (!%p140_p2)  ;;  %v202_v1 = vld [vmem:[%s643_s1 + $0x88] sm:$0xff] (!%p140_p2)  ;;  %s375_s20 = sshll.u32 (!%p140_p2), %s370_s13, 2  ;;  %v203_v5 = vld [vmem:[%s643_s1 + $0x90] sm:$0xff] (!%p140_p2)  ;;  %vm309_vm0 = vcmask (!%p140_p2), 130048  }
   0x6   : > { %143 = sbr.rel (%p140_p2) target bundleno = 263 (0x107), region = 32  ;;  %v185_v2 = vld [vmem:[%s643_s1] sm:$0xff] (!%p140_p2)  ;;  %v428_v3 = vpack.c.bf16 (!%p140_p2), %v202_v1, %v201_v0  ;;  %v186_v4 = vld [vmem:[%s643_s1 + $0x8] sm:$0xff] (!%p140_p2)  ;;  %v204_v6 = vld [vmem:[%s643_s1 + $0x98] sm:$0xff] (!%p140_p2)  ;;  %p165_p3 = scmp.lt.s32.totalorder (!%p140_p2), %s375_s20, 7 }
   0x7   : > { %v430_v7 = vpack.c.bf16 (!%p140_p2), %v186_v4, %v185_v2  ;;  %v432_v8 = vpack.c.bf16 (!%p140_p2), %v204_v6, %v203_v5  ;;  %v187_v9 = vld [vmem:[%s643_s1 + $0x10] sm:$0xff] (!%p140_p2)  ;;  %v188_v10 = vld [vmem:[%s643_s1 + $0x18] sm:$0xff] (!%p140_p2)  ;;  %v205_v11 = vld [vmem:[%s643_s1 + $0xa0] sm:$0xff] (!%p140_p2) }
   0x8   : > { %429 = vmatprep.subr.bf16.mxu0 (!%p140_p2), %v428_v3  ;;  %460 = vmatprep.subr.bf16.mxu1 (!%p140_p2), %v428_v3  ;;  %v206_v12 = vld [vmem:[%s643_s1 + $0xa8] sm:$0xff] (!%p140_p2)  ;;  %v434_v13 = vpack.c.bf16 (!%p140_p2), %v188_v10, %v187_v9  ;;  %v189_v15 = vld [vmem:[%s643_s1 + $0x20] sm:$0xff] (!%p140_p2)  ;;  %v207_v17 = vld [vmem:[%s643_s1 + $0xb0] sm:$0xff] (!%p140_p2) }
   0x9   : > { %431 = vmatpush3.bf16.msra.mxu0 (!%p140_p2), %v430_v7  ;;  %468 = vmatpush3.bf16.msra.mxu1 (!%p140_p2), %v430_v7  ;;  %v436_v14 = vpack.c.bf16 (!%p140_p2), %v206_v12, %v205_v11  ;;  %v190_v16 = vld [vmem:[%s643_s1 + $0x28] sm:$0xff] (!%p140_p2)  ;;  %v208_v18 = vld [vmem:[%s643_s1 + $0xb8] sm:$0xff] (!%p140_p2)  ;;  %v191_v21 = vld [vmem:[%s643_s1 + $0x30] sm:$0xff] (!%p140_p2) }
   0xa   : > { %433 = vmatprep.subr.bf16.mxu0 (!%p140_p2), %v432_v8  ;;  %461 = vmatprep.subr.bf16.mxu1 (!%p140_p2), %v432_v8  ;;  %v438_v19 = vpack.c.bf16 (!%p140_p2), %v190_v16, %v189_v15  ;;  %v440_v20 = vpack.c.bf16 (!%p140_p2), %v208_v18, %v207_v17  ;;  %v192_v22 = vld [vmem:[%s643_s1 + $0x38] sm:$0xff] (!%p140_p2)  ;;  %v209_v23 = vld [vmem:[%s643_s1 + $0xc0] sm:$0xff] (!%p140_p2)  ;;  %v210_v24 = vld [vmem:[%s643_s1 + $0xc8] sm:$0xff] (!%p140_p2) }
   0xb   : > { %v442_v27 = vpack.c.bf16 (!%p140_p2), %v192_v22, %v191_v21  ;;  %v444_v28 = vpack.c.bf16 (!%p140_p2), %v210_v24, %v209_v23  ;;  %v193_v29 = vld [vmem:[%s643_s1 + $0x40] sm:$0xff] (!%p140_p2)  ;;  %v194_v30 = vld [vmem:[%s643_s1 + $0x48] sm:$0xff] (!%p140_p2)  ;;  %v211_v31 = vld [vmem:[%s643_s1 + $0xd0] sm:$0xff] (!%p140_p2) }
   0xc   : > { %v212_v32 = vld [vmem:[%s643_s1 + $0xd8] sm:$0xff] (!%p140_p2)  ;;  %v446_v33 = vpack.c.bf16 (!%p140_p2), %v194_v30, %v193_v29  ;;  %v195_v35 = vld [vmem:[%s643_s1 + $0x50] sm:$0xff] (!%p140_p2)  ;;  %v213_v37 = vld [vmem:[%s643_s1 + $0xe0] sm:$0xff] (!%p140_p2) }
   0xd   : > { %s647_s20 = smov (!%p165_p3, %s375_s20), 7  ;;  %435 = vmatpush3.bf16.msra.mxu0 %v434_v13  ;;  %469 = vmatpush3.bf16.msra.mxu1 %v434_v13  ;;  %v448_v34 = vpack.c.bf16 %v212_v32, %v211_v31  ;;  %v196_v36 = vld [vmem:[%s643_s1 + $0x58] sm:$0xff]  ;;  %v214_v38 = vld [vmem:[%s643_s1 + $0xe8] sm:$0xff]  ;;  %v197_v41 = vld [vmem:[%s643_s1 + $0x60] sm:$0xff] }
   0xe   : > { %s383_s13 = sshll.u32 %s647_s20, 4  ;;  %437 = vmatprep.subr.bf16.mxu0 %v436_v14  ;;  %462 = vmatprep.subr.bf16.mxu1 %v436_v14  ;;  %v450_v39 = vpack.c.bf16 %v196_v36, %v195_v35  ;;  %v452_v40 = vpack.c.bf16 %v214_v38, %v213_v37  ;;  %v198_v42 = vld [vmem:[%s643_s1 + $0x68] sm:$0xff]  ;;  %v215_v43 = vld [vmem:[%s643_s1 + $0xf0] sm:$0xff]  ;;  %v216_v44 = vld [vmem:[%s643_s1 + $0xf8] sm:$0xff]  ;;  %s379_s7 = sshll.u32 %s647_s20, 3 }
   0xf   : > { %s568_s21 = scalar_lea.vmem %s642_s0, %s383_s13  ;;  %v454_v45 = vpack.c.bf16 %v198_v42, %v197_v41  ;;  %v456_v46 = vpack.c.bf16 %v216_v44, %v215_v43  ;;  %v199_v47 = vld [vmem:[%s643_s1 + $0x70] sm:$0xff]  ;;  %v200_v48 = vld [vmem:[%s643_s1 + $0x78] sm:$0xff]  ;;  %v380_v58 = vld [vmem:[%s644_s2] ss:$0 sm:$0xff]  ;;  %s175_s13 = scalar_lea.vmem %s645_s3, %s379_s7 }
  0x10   : > { %v178_v25 = vld [vmem:[%s568_s21 + $0x8] sm:$0xff]  ;;  %v458_v49 = vpack.c.bf16 %v200_v48, %v199_v47  ;;  %v177_v50 = vld [vmem:[%s568_s21] sm:$0xff]  ;;  %v180_v52 = vld [vmem:[%s568_s21 + $0x18] sm:$0xff] }
  0x11   : > { %288 = vmatprep.mubr.f32.mxu0 %v178_v25  ;;  %v182_v26 = vld [vmem:[%s568_s21 + $0x28] sm:$0xff]  ;;  %439 = vmatpush3.bf16.msra.mxu0 %v438_v19  ;;  %v181_v51 = vld [vmem:[%s568_s21 + $0x20] sm:$0xff]  ;;  %v184_v53 = vld [vmem:[%s568_s21 + $0x38] sm:$0xff] }
  0x12   : > { %470 = vmatpush3.bf16.msra.mxu1 %v438_v19  ;;  %441 = vmatprep.subr.bf16.mxu0 %v440_v20  ;;  %v179_v54 = vld [vmem:[%s568_s21 + $0x10] sm:$0xff] }
  0x13   : > { %463 = vmatprep.subr.bf16.mxu1 %v440_v20  ;;  %298 = vmatprep.mubr.f32.mxu1 %v182_v26  ;;  %v183_v55 = vld [vmem:[%s568_s21 + $0x30] sm:$0xff] }
  0x15   : > { %443 = vmatpush3.bf16.msra.mxu0 %v442_v27 }
  0x16   : > { %471 = vmatpush3.bf16.msra.mxu1 %v442_v27  ;;  %445 = vmatprep.subr.bf16.mxu0 %v444_v28 }
  0x17   : > { %464 = vmatprep.subr.bf16.mxu1 %v444_v28 }
  0x19   : > { %447 = vmatpush3.bf16.msra.mxu0 %v446_v33 }
  0x1a   : > { %472 = vmatpush3.bf16.msra.mxu1 %v446_v33  ;;  %449 = vmatprep.subr.bf16.mxu0 %v448_v34 }
  0x1b   : > { %465 = vmatprep.subr.bf16.mxu1 %v448_v34 }
  0x1d   : > { %451 = vmatpush3.bf16.msra.mxu0 %v450_v39 }
  0x1e   : > { %473 = vmatpush3.bf16.msra.mxu1 %v450_v39  ;;  %453 = vmatprep.subr.bf16.mxu0 %v452_v40 }
  0x1f   : > { %466 = vmatprep.subr.bf16.mxu1 %v452_v40 }
  0x21   : > { %455 = vmatpush3.bf16.msra.mxu0 %v454_v45 }
  0x22   : > { %474 = vmatpush3.bf16.msra.mxu1 %v454_v45  ;;  %457 = vmatprep.subr.bf16.mxu0 %v456_v46 }
  0x23   : > { %467 = vmatprep.subr.bf16.mxu1 %v456_v46 }
  0x25   : > { %459 = vmatpush3.bf16.msra.mxu0 %v458_v49 }
  0x26   : > { %475 = vmatpush3.bf16.msra.mxu1 %v458_v49 }
  0x28   : > { %289 = vmatmul.mubr.f32.vlgmr.msra.gmra.mrb[0].mxu0 %v177_v50 }
  0x29   : > { %299 = vmatmul.mubr.f32.vlgmr.msra.gmra.mrb[0].mxu1 %v181_v51  ;;  %293 = vmatprep.mubr.f32.mxu0 %v180_v52 }
  0x2a   : > { %303 = vmatprep.mubr.f32.mxu1 %v184_v53 }
  0x2c   : > { %294 = vmatmul.mubr.f32.gmra.mrb[2].mxu0 %v179_v54 }
  0x2d   : > { %304 = vmatmul.mubr.f32.gmra.mrb[2].mxu1 %v183_v55 }
  0xfb   : > { %v416_v56 = vpop.f32.mrb[0].mxu0 }
  0xfc   : > { %v422_v57 = vpop.f32.mrb[0].mxu1  ;;  %v417_v59 = vpop.f32.mrb[1].mxu0 }
  0xfd   : > { %v423_v60 = vpop.f32.mrb[1].mxu1  ;;  %v418_v61 = vadd.f32 %v417_v59, %v416_v56 }
  0xfe   : > { %v424_v62 = vadd.f32 %v423_v60, %v422_v57 }
  0xff   : > { %v291_v63 = vadd.f32 %v418_v61, %v380_v58  ;;  %v419_v0 = vpop.f32.mrb[2].mxu0 }
 0x100   : > { %v425_v1 = vpop.f32.mrb[2].mxu1  ;;  %v420_v2 = vpop.f32.mrb[3].mxu0  ;;  %v301_v8 = vadd.f32 %v424_v62, %v380_v58 }
 0x101   : > { %v426_v3 = vpop.f32.mrb[3].mxu1  ;;  %310 = vst.msk [vmem:[%s175_s13] sm:$0xff] %vm309_vm0, %v291_v63  ;;  %v421_v4 = vadd.f32 %v420_v2, %v419_v0 }
 0x102   : > { %v427_v5 = vadd.f32 %v426_v3, %v425_v1  ;;  %312 = vst.msk [vmem:[%s175_s13 + $0x10] sm:$0xff] %vm309_vm0, %v301_v8 }
 0x103   : > { %v296_v6 = vadd.f32 %v421_v4, %v380_v58 }
 0x104   : > { %v306_v7 = vadd.f32 %v427_v5, %v380_v58 }
 0x105   : > { %311 = vst.msk [vmem:[%s175_s13 + $0x8] sm:$0xff] %vm309_vm0, %v296_v6 }
 0x106   : > { %313 = vst.msk [vmem:[%s175_s13 + $0x18] sm:$0xff] %vm309_vm0, %v306_v7 }
 0x107 PF: > { %s13_s12 = sadd.s32 1, %s490_s12  }
 0x108   : > { %p10_p4 = scmp.ge.s32.totalorder %s13_s12, 4  }
 0x10a   :  { %12 = sbr.rel (!%p10_p4) target bundleno = 1 (0x1), region = 62 }

</bundles_post_ra>
